<compile_context>
chip_gen: v7x
topology: tpu7x:2x2x1
jax: 0.10.0
libtpu: 0.0.40
codegen_flags: <defaults>
</compile_context>

<pallas_src>
import functools

import jax
import jax.numpy as jnp
from jax import lax
from jax.experimental import pallas as pl
from jax.experimental.pallas import tpu as pltpu

NEG_SLOPE = 0.01        # nn.LeakyReLU default
BN_EPS = 1e-5           # nn.BatchNorm1d default
H1, H2 = 32, 8          # fc_sizes = [32, 8]
TILE_T_MAX = 1024       # max time tile (lane-dense, multiple of 128)
TILE_B_MAX = 32         # max batch tile
CHUNK_T = 128           # in-kernel compute sub-chunk (keeps intermediates small)


def _leaky(x):
    return jnp.where(x > 0, x, NEG_SLOPE * x)


def _round_up(x, m):
    return ((x + m - 1) // m) * m


def _choose_tiles(B, T, f):
    """Pick (tile_b, tile_t) satisfying the (8,128)/full-dim BlockSpec rules, sized for
    ~8 MiB of (lane-padded) input block per buffer, with >=2 grid steps when possible."""
    tile_b = B if B <= TILE_B_MAX else TILE_B_MAX
    lane_f = _round_up(max(f, 1), 128)                      # f is the minor dim -> lane pad
    budget = 8 * 1024 * 1024                                # bytes per (bf16) input buffer
    t_cap = max(128, (budget // (tile_b * lane_f * 2) // 128) * 128)
    tile_t_max = min(TILE_T_MAX, t_cap)

    if T <= 128:
        tile_t = T                                          # full extent: always legal
    else:
        tile_t = min(tile_t_max, (T // 128) * 128)          # largest 128-multiple <= T
        # v7x has 2 TensorCores: keep >=2 grid steps along a parallel axis if batch is 1 tile.
        if tile_b == B and -(-T // tile_t) < 2:
            tile_t = max(128, _round_up(-(-T // 2), 128))
    return tile_b, tile_t


def _mlp_head_kernel(local_ref, gb_ref, w1l_ref, w2_ref, b2_ref, w3_ref, b3_ref,
                     out_ref, *, chunk):
    """One (tile_b, tile_t) block of tokens through the BN-folded MLP head.
    The big DMA block is processed in `chunk`-token sub-chunks so intermediates stay
    small (in vregs / small scratch) instead of spilling as lane-padded VMEM."""
    tb, tt, f = local_ref.shape
    n_chunks = tt // chunk

    # Hoisted loads (loop is unrolled; avoid re-broadcasting per iteration).
    w1 = w1l_ref[...]                       # (f, H1)  bf16
    w2 = w2_ref[...]                        # (H1, H2) bf16
    gbx = gb_ref[...][:, None, :]           # (tb, 1, H1) f32 : per-batch global contrib + b1
    b2 = b2_ref[...][None, :, :]            # (1, 1, H2)
    w3 = w3_ref[...][None, :, :]            # (1, 1, H2)
    b3 = b3_ref[...]                        # (1, 1)

    def body(c, carry):
        t0 = c * chunk
        if chunk % 128 == 0:
            t0 = pl.multiple_of(t0, 128)
        x = local_ref[:, pl.ds(t0, chunk), :]                              # (tb, chunk, f) bf16

        # Layer 1 (BatchNorm folded into w1 / gbx): MXU matmul, f32 accumulation.
        z1 = jnp.dot(x.reshape(tb * chunk, f), w1,
                     preferred_element_type=jnp.float32)
        a1 = _leaky(z1.reshape(tb, chunk, H1) + gbx)

        # Layer 2: (tb*chunk, 32) @ (32, 8).
        z2 = jnp.dot(a1.reshape(tb * chunk, H1).astype(jnp.bfloat16), w2,
                     preferred_element_type=jnp.float32)
        a2 = _leaky(z2.reshape(tb, chunk, H2) + b2)

        # Final 8 -> 1 "prob" layer on the VPU (multiply + small reduce) -> lane-dense out.
        z3 = jnp.sum(a2 * w3, axis=-1) + b3                                # (tb, chunk)
        out_ref[:, pl.ds(t0, chunk)] = _leaky(z3).astype(out_ref.dtype)
        return carry

    lax.fori_loop(0, n_chunks, body, 0, unroll=True)


def init_params(key, f_dim, z_dim, fc_sizes=(32, 8)):
    """PyTorch-style uniform fan-in init.  NOTE: weights are stored (in, out);
    loading trained nn.Linear weights ((out, in)) would require a transpose."""
    assert tuple(fc_sizes) == (H1, H2)
    C = f_dim + z_dim
    dims = [C, H1, H2, 1]
    params = {}
    for n, (din, dout) in enumerate(zip(dims[:-1], dims[1:]), start=1):
        key, kw, kb = jax.random.split(key, 3)
        bound = 1.0 / (din ** 0.5)
        params[f"w{n}"] = jax.random.uniform(kw, (din, dout), jnp.float32, -bound, bound)
        params[f"b{n}"] = jax.random.uniform(kb, (dout,), jnp.float32, -bound, bound)
    params["gamma"] = jnp.ones((C,), jnp.float32)     # BatchNorm affine
    params["beta"] = jnp.zeros((C,), jnp.float32)
    return params


@jax.jit
def predictor_forward(local_encs, global_encs, params):
    """local_encs (B,T,f), global_encs (B,z) -> (B,T) f32 (== probs.squeeze(-1))."""
    B, T, f = local_encs.shape
    z = global_encs.shape[-1]
    C = f + z
    assert params["w1"].shape == (C, H1)

    local_f32 = local_encs.astype(jnp.float32)
    global_f32 = global_encs.astype(jnp.float32)

    # ---- Pass 1: BatchNorm1d training-mode statistics over all B*T tokens ----
    # Shifted single-pass variance (shift = representative per-channel sample) avoids the
    # catastrophic cancellation of naive E[x^2]-E[x]^2 with a single read of local_encs.
    s_l = lax.stop_gradient(local_f32[0, 0, :])
    dl = local_f32 - s_l
    m_dl = jnp.mean(dl, axis=(0, 1))
    m_dl2 = jnp.mean(jnp.square(dl), axis=(0, 1))
    mean_l = s_l + m_dl
    var_l = jnp.maximum(m_dl2 - jnp.square(m_dl), 0.0)

    s_g = lax.stop_gradient(global_f32[0, :])
    dg = global_f32 - s_g
    m_dg = jnp.mean(dg, axis=0)
    m_dg2 = jnp.mean(jnp.square(dg), axis=0)
    mean_g = s_g + m_dg
    var_g = jnp.maximum(m_dg2 - jnp.square(m_dg), 0.0)

    mean = jnp.concatenate([mean_l, mean_g])                               # (C,)
    var = jnp.concatenate([var_l, var_g])                                  # biased (train mode)

    # ---- Fold BN into the first Linear; split it into local / global parts ----
    scale = params["gamma"] * lax.rsqrt(var + BN_EPS)                      # (C,)
    shift = params["beta"] - mean * scale                                  # (C,)
    w1_eff = params["w1"] * scale[:, None]                                 # (C, 32)
    b1_eff = params["b1"] + shift @ params["w1"]                           # (32,)
    w1_local = w1_eff[:f]                                                  # (f, 32)
    gb = global_f32 @ w1_eff[f:] + b1_eff[None, :]                         # (B, 32)

    # Kernel consumes local_encs only as a bf16 MXU operand: halve HBM read + VMEM block.
    local_bf16 = local_f32.astype(jnp.bfloat16)

    # ---- Tiling: large DMA blocks, cdiv grid (Pallas masks partial edge blocks) ----
    tile_b, tile_t = _choose_tiles(B, T, f)
    chunk = tile_t if tile_t < CHUNK_T else CHUNK_T
    grid = (pl.cdiv(B, tile_b), pl.cdiv(T, tile_t))

    kernel = functools.partial(_mlp_head_kernel, chunk=chunk)

    cost = pl.CostEstimate(
        flops=2 * B * T * (f * H1 + H1 * H2 + H2),
        transcendentals=0,
        bytes_accessed=B * T * f * 2 + B * T * 4 + B * H1 * 4,
    )

    out = pl.pallas_call(
        kernel,
        out_shape=jax.ShapeDtypeStruct((B, T), jnp.float32),
        grid=grid,
        in_specs=[
            pl.BlockSpec((tile_b, tile_t, f), lambda i, j: (i, j, 0)),   # local tokens (bf16)
            pl.BlockSpec((tile_b, H1), lambda i, j: (i, 0)),             # per-batch global + b1
            pl.BlockSpec((f, H1), lambda i, j: (0, 0)),                  # folded W1 (local part)
            pl.BlockSpec((H1, H2), lambda i, j: (0, 0)),                 # W2
            pl.BlockSpec((1, H2), lambda i, j: (0, 0)),                  # b2
            pl.BlockSpec((1, H2), lambda i, j: (0, 0)),                  # w3 (prob layer) row
            pl.BlockSpec((1, 1), lambda i, j: (0, 0)),                   # b3
        ],
        out_specs=pl.BlockSpec((tile_b, tile_t), lambda i, j: (i, j)),
        compiler_params=pltpu.CompilerParams(
            dimension_semantics=("parallel", "parallel"),
            vmem_limit_bytes=48 * 1024 * 1024,
        ),
        cost_estimate=cost,
    )(
        local_bf16,
        gb,
        w1_local.astype(jnp.bfloat16),
        params["w2"].astype(jnp.bfloat16),
        params["b2"].reshape(1, H2),
        params["w3"].reshape(1, H2),
        params["b3"].reshape(1, 1),
    )
    return out


def _reference_forward(local_encs, global_encs, params):
    """Pure-jnp f32 replica of the PyTorch forward, for validation."""
    B, T, f = local_encs.shape
    g = jnp.broadcast_to(global_encs[:, None, :], (B, T, global_encs.shape[-1]))
    h = jnp.concatenate([local_encs, g], axis=2).reshape(B * T, -1)
    mean = h.mean(axis=0)
    var = ((h - mean) ** 2).mean(axis=0)
    hn = (h - mean) * lax.rsqrt(var + BN_EPS) * params["gamma"] + params["beta"]
    a1 = _leaky(hn @ params["w1"] + params["b1"])
    a2 = _leaky(a1 @ params["w2"] + params["b2"])
    out = _leaky(a2 @ params["w3"] + params["b3"])
    return out.reshape(B, T)


def _run_case(key, B, T, f_dim, z_dim):
    k_local, k_global, k_params = jax.random.split(key, 3)
    local_encs = jax.random.normal(k_local, (B, T, f_dim), jnp.float32)
    global_encs = jax.random.normal(k_global, (B, z_dim), jnp.float32)
    _ = jnp.full((B,), T, jnp.int32)   # x_lens: unused by the module's forward
    params = init_params(k_params, f_dim, z_dim)

    probs = predictor_forward(local_encs, global_encs, params)
    jax.block_until_ready(probs)
    assert probs.shape == (B, T)

    # Loose tolerance: kernel uses bf16 matmul operands with f32 accumulation.
    ref = _reference_forward(local_encs, global_encs, params)
    err = float(jnp.max(jnp.abs(probs - ref)))
    assert jnp.allclose(probs, ref, atol=1e-1, rtol=1e-1), err


if __name__ == "__main__":
    key = jax.random.PRNGKey(0)
    k1, k2 = jax.random.split(key)

    # Small, module-consistent shapes: f_dim + z_dim = 32 feeds BatchNorm1d and Linear(C, 32).
    _run_case(k1, B=2, T=8, f_dim=24, z_dim=8)
    # Slightly larger case exercising multi-tile grid + partial edge block + chunked loop.
    _run_case(k2, B=4, T=300, f_dim=24, z_dim=8)

    print("KERNEL_OK")
</pallas_src>

<mosaic_0001>
module attributes {stable_mosaic.version = 11 : i64} {
  func.func @_mlp_head_kernel(%arg0: i32, %arg1: i32, %arg2: memref<2x8x24xbf16, #tpu.memory_space<vmem>>, %arg3: memref<2x32xf32, #tpu.memory_space<vmem>>, %arg4: memref<24x32xbf16, #tpu.memory_space<vmem>>, %arg5: memref<32x8xbf16, #tpu.memory_space<vmem>>, %arg6: memref<1x8xf32, #tpu.memory_space<vmem>>, %arg7: memref<1x8xf32, #tpu.memory_space<vmem>>, %arg8: memref<1x1xf32, #tpu.memory_space<vmem>>, %arg9: memref<2x8xf32, #tpu.memory_space<vmem>>) attributes {dimension_semantics = [#tpu.dimension_semantics<parallel>, #tpu.dimension_semantics<parallel>], iteration_bounds = array<i64: 1, 1>, scalar_prefetch = 0 : i64, scratch_operands = 0 : i64, tpu.core_type = #tpu.core_type<tc>, window_params = [{transform_indices = @transform_0, window_bounds = array<i64: 2, 8, 24>}, {transform_indices = @transform_1, window_bounds = array<i64: 2, 32>}, {pipeline_mode = #tpu.pipeline_mode<synchronous>, transform_indices = @transform_2, window_bounds = array<i64: 24, 32>}, {pipeline_mode = #tpu.pipeline_mode<synchronous>, transform_indices = @transform_3, window_bounds = array<i64: 32, 8>}, {pipeline_mode = #tpu.pipeline_mode<synchronous>, transform_indices = @transform_4, window_bounds = array<i64: 1, 8>}, {pipeline_mode = #tpu.pipeline_mode<synchronous>, transform_indices = @transform_5, window_bounds = array<i64: 1, 8>}, {pipeline_mode = #tpu.pipeline_mode<synchronous>, transform_indices = @transform_6, window_bounds = array<i64: 1, 1>}, {transform_indices = @transform_7, window_bounds = array<i64: 2, 8>}]} {
    %c0 = arith.constant 0 : index
    %c0_0 = arith.constant 0 : index
    %0 = vector.load %arg4[%c0, %c0_0] : memref<24x32xbf16, #tpu.memory_space<vmem>>, vector<24x32xbf16>
    %c0_1 = arith.constant 0 : index
    %c0_2 = arith.constant 0 : index
    %1 = vector.load %arg5[%c0_1, %c0_2] : memref<32x8xbf16, #tpu.memory_space<vmem>>, vector<32x8xbf16>
    %c0_3 = arith.constant 0 : index
    %c0_4 = arith.constant 0 : index
    %2 = vector.load %arg3[%c0_3, %c0_4] : memref<2x32xf32, #tpu.memory_space<vmem>>, vector<2x32xf32>
    %3 = vector.shape_cast %2 : vector<2x32xf32> to vector<2x1x32xf32>
    %c0_5 = arith.constant 0 : index
    %c0_6 = arith.constant 0 : index
    %4 = vector.load %arg6[%c0_5, %c0_6] : memref<1x8xf32, #tpu.memory_space<vmem>>, vector<1x8xf32>
    %5 = vector.shape_cast %4 : vector<1x8xf32> to vector<1x1x8xf32>
    %c0_7 = arith.constant 0 : index
    %c0_8 = arith.constant 0 : index
    %6 = vector.load %arg7[%c0_7, %c0_8] : memref<1x8xf32, #tpu.memory_space<vmem>>, vector<1x8xf32>
    %7 = vector.shape_cast %6 : vector<1x8xf32> to vector<1x1x8xf32>
    %c0_9 = arith.constant 0 : index
    %c0_10 = arith.constant 0 : index
    %8 = vector.load %arg8[%c0_9, %c0_10] : memref<1x1xf32, #tpu.memory_space<vmem>>, vector<1x1xf32>
    %c0_i32 = arith.constant 0 : i32
    %c8_i32 = arith.constant 8 : i32
    %9 = arith.muli %c0_i32, %c8_i32 : i32
    %c0_11 = arith.constant 0 : index
    %10 = arith.index_cast %9 : i32 to index
    %c0_12 = arith.constant 0 : index
    %11 = vector.load %arg2[%c0_11, %10, %c0_12] : memref<2x8x24xbf16, #tpu.memory_space<vmem>>, vector<2x8x24xbf16>
    %12 = vector.shape_cast %11 : vector<2x8x24xbf16> to vector<16x24xbf16>
    %cst = arith.constant dense<0.000000e+00> : vector<16x32xf32>
    %13 = tpu.matmul %12, %0, %cst {dimension_numbers = #tpu.dot_dimension_numbers<[1], [0], [0], [1], [0, 0, 1, 1], [], []>} : vector<16x24xbf16>, vector<24x32xbf16>, vector<16x32xf32> -> vector<16x32xf32>
    %14 = vector.shape_cast %13 : vector<16x32xf32> to vector<2x8x32xf32>
    %15 = vector.broadcast %3 : vector<2x1x32xf32> to vector<2x8x32xf32>
    %16 = arith.addf %14, %15 : vector<2x8x32xf32>
    %cst_13 = arith.constant 0.000000e+00 : f32
    %17 = vector.broadcast %cst_13 : f32 to vector<2x8x32xf32>
    %18 = arith.cmpf ogt, %16, %17 : vector<2x8x32xf32>
    %cst_14 = arith.constant 0.00999999977 : f32
    %19 = vector.broadcast %cst_14 : f32 to vector<2x8x32xf32>
    %20 = arith.mulf %19, %16 : vector<2x8x32xf32>
    %21 = arith.select %18, %16, %20 : vector<2x8x32xi1>, vector<2x8x32xf32>
    %22 = vector.shape_cast %21 : vector<2x8x32xf32> to vector<16x32xf32>
    %23 = arith.truncf %22 : vector<16x32xf32> to vector<16x32xbf16>
    %cst_15 = arith.constant dense<0.000000e+00> : vector<16x8xf32>
    %24 = tpu.matmul %23, %1, %cst_15 {dimension_numbers = #tpu.dot_dimension_numbers<[1], [0], [0], [1], [0, 0, 1, 1], [], []>} : vector<16x32xbf16>, vector<32x8xbf16>, vector<16x8xf32> -> vector<16x8xf32>
    %25 = vector.shape_cast %24 : vector<16x8xf32> to vector<2x8x8xf32>
    %26 = vector.broadcast %5 : vector<1x1x8xf32> to vector<2x8x8xf32>
    %27 = arith.addf %25, %26 : vector<2x8x8xf32>
    %cst_16 = arith.constant 0.000000e+00 : f32
    %28 = vector.broadcast %cst_16 : f32 to vector<2x8x8xf32>
    %29 = arith.cmpf ogt, %27, %28 : vector<2x8x8xf32>
    %cst_17 = arith.constant 0.00999999977 : f32
    %30 = vector.broadcast %cst_17 : f32 to vector<2x8x8xf32>
    %31 = arith.mulf %30, %27 : vector<2x8x8xf32>
    %32 = arith.select %29, %27, %31 : vector<2x8x8xi1>, vector<2x8x8xf32>
    %33 = vector.broadcast %7 : vector<1x1x8xf32> to vector<2x8x8xf32>
    %34 = arith.mulf %32, %33 : vector<2x8x8xf32>
    %cst_18 = arith.constant dense<0.000000e+00> : vector<2x8xf32>
    %35 = vector.multi_reduction <add>, %34, %cst_18 [2] : vector<2x8x8xf32> to vector<2x8xf32>
    %36 = vector.broadcast %8 : vector<1x1xf32> to vector<2x8xf32>
    %37 = arith.addf %35, %36 : vector<2x8xf32>
    %cst_19 = arith.constant 0.000000e+00 : f32
    %38 = vector.broadcast %cst_19 : f32 to vector<2x8xf32>
    %39 = arith.cmpf ogt, %37, %38 : vector<2x8xf32>
    %cst_20 = arith.constant 0.00999999977 : f32
    %40 = vector.broadcast %cst_20 : f32 to vector<2x8xf32>
    %41 = arith.mulf %40, %37 : vector<2x8xf32>
    %42 = arith.select %39, %37, %41 : vector<2x8xi1>, vector<2x8xf32>
    %c0_21 = arith.constant 0 : index
    %43 = arith.index_cast %9 : i32 to index
    %44 = vector.load %arg9[%c0_21, %43] : memref<2x8xf32, #tpu.memory_space<vmem>>, vector<2x8xf32>
    tpu.vector_store %arg9[%c0_21, %43], %42 {strides = array<i32>} : memref<2x8xf32, #tpu.memory_space<vmem>>, vector<2x8xf32>,
    %c1_i32 = arith.constant 1 : i32
    return
  }
  func.func @transform_0(%arg0: i32, %arg1: i32) -> (i32, i32, i32) {
    %c0_i32 = arith.constant 0 : i32
    %c0_i32_0 = arith.constant 0 : i32
    return %arg0, %arg1, %c0_i32 : i32, i32, i32
  }
  func.func @transform_1(%arg0: i32, %arg1: i32) -> (i32, i32) {
    %c0_i32 = arith.constant 0 : i32
    %c0_i32_0 = arith.constant 0 : i32
    return %arg0, %c0_i32 : i32, i32
  }
  func.func @transform_2(%arg0: i32, %arg1: i32) -> (i32, i32) {
    %c0_i32 = arith.constant 0 : i32
    %c0_i32_0 = arith.constant 0 : i32
    %c0_i32_1 = arith.constant 0 : i32
    return %c0_i32, %c0_i32_0 : i32, i32
  }
  func.func @transform_3(%arg0: i32, %arg1: i32) -> (i32, i32) {
    %c0_i32 = arith.constant 0 : i32
    %c0_i32_0 = arith.constant 0 : i32
    %c0_i32_1 = arith.constant 0 : i32
    return %c0_i32, %c0_i32_0 : i32, i32
  }
  func.func @transform_4(%arg0: i32, %arg1: i32) -> (i32, i32) {
    %c0_i32 = arith.constant 0 : i32
    %c0_i32_0 = arith.constant 0 : i32
    %c0_i32_1 = arith.constant 0 : i32
    return %c0_i32, %c0_i32_0 : i32, i32
  }
  func.func @transform_5(%arg0: i32, %arg1: i32) -> (i32, i32) {
    %c0_i32 = arith.constant 0 : i32
    %c0_i32_0 = arith.constant 0 : i32
    %c0_i32_1 = arith.constant 0 : i32
    return %c0_i32, %c0_i32_0 : i32, i32
  }
  func.func @transform_6(%arg0: i32, %arg1: i32) -> (i32, i32) {
    %c0_i32 = arith.constant 0 : i32
    %c0_i32_0 = arith.constant 0 : i32
    %c0_i32_1 = arith.constant 0 : i32
    return %c0_i32, %c0_i32_0 : i32, i32
  }
  func.func @transform_7(%arg0: i32, %arg1: i32) -> (i32, i32) {
    %c0_i32 = arith.constant 0 : i32
    return %arg0, %arg1 : i32, i32
  }
}

</mosaic_0001>

<bundles_post_ra>
// kernel: predictor_forward.1
= control target key start
LH: loop header
LB: loop body
LE: loop exit
PB: predicated region body
PF: predicated region fallthrough
CT: control target
= control target key end

     0   :  { %s435_s0 = inlined_call_operand.vmem [shape: bf16[2,8,24], index: 0, kind: input, shape index: {}]   ;;  %s436_s1 = inlined_call_operand.vmem [shape: f32[2,32], index: 1, kind: input, shape index: {}]   ;;  %s437_s2 = inlined_call_operand.vmem [shape: bf16[24,32], index: 2, kind: input, shape index: {}]   ;;  %s438_s3 = inlined_call_operand.vmem [shape: bf16[32,8], index: 3, kind: input, shape index: {}]   ;;  %s439_s4 = inlined_call_operand.vmem [shape: f32[1,8], index: 4, kind: input, shape index: {}]   ;;  %s440_s5 = inlined_call_operand.vmem [shape: f32[1,8], index: 5, kind: input, shape index: {}]   ;;  %s441_s6 = inlined_call_operand.<no memory space> [shape: f32[1,1], index: 6, kind: input, shape index: {}]   ;;  %s442_s7 = inlined_call_operand.hbm [shape: f32[2,8], index: 7, kind: output, shape index: {}]  }
   0x1   :  { %v12_v0 = vstv %s441_s6 }
   0x2   :  { %13 = vst [vmem:[#allocation2] sm:$0x1] %v12_v0 }
   0x3   :  { %v322_v1 = vld [vmem:[%s437_s2] sm:$0xff]   ;;  %v351_v2 = vmov 0.0   ;;  %v323_v3 = vld [vmem:[%s437_s2 + $0x8] ss:$0 sps:$4 sm:$0xff]   ;;  %vm84_vm0 = vcmask 1043456   ;;  %vm352_vm1 = vmmov 0  }
   0x4   :  { %299 = vmatprep.subr.bf16.mxu0 %v351_v2  ;;  %307 = vmatprep.subr.bf16.mxu1 %v351_v2  ;;  %v86_v4 = vsel %vm84_vm0, %v323_v3, 0  ;;  %v324_v5 = vld [vmem:[%s435_s0] sm:$0xff]  }
   0x5   :  { %300 = vmatpush3.bf16.msra.mxu0 %v322_v1  ;;  %303 = vmatprep.mubr.msk.bf16.mxu0 %vm352_vm1, %v351_v2 }
   0x6   :  { %301 = vmatprep.subr.bf16.mxu0 %v351_v2  ;;  %311 = vmatprep.mubr.msk.bf16.mxu1 %vm352_vm1, %v351_v2 }
   0x7   :  { %14 = vsyncpa [#allocation4], 0  ;;  %vm80_vm2 = vcmask 195584   ;;  %v325_v6 = vld [vmem:[%s438_s3] sm:$0xff]   ;;  %v326_v7 = vld [vmem:[%s438_s3 + $0x8] sm:$0xff]   ;;  %v50_v10 = vlaneseq  ;;  %vm160_vm5 = vcmask 261120  }
   0x8   :  { %308 = vmatpush3.bf16.msra.mxu1 %v325_v6  ;;  %v353_v8 = vmov 1966171168   ;;  %v282_v13 = vld.sshfl [vmem:[%s436_s1] sm:$0x11 pattern:$0x75316420] }
   0x9   :  { %302 = vmatpush3.bf16.msra.mxu0 %v86_v4  ;;  %309 = vmatprep.subr.bf16.mxu1 %v351_v2  ;;  %v48_v9 = vunpack.c.l.s4 %v353_v8  ;;  %v51_v12 = vshrl.u32 %v50_v10, 7  ;;  %v46_v15 = vcombine.high %v282_v13, %v282_v13  ;;  %v292_v32 = vld [vmem:[#allocation2] ss:$0 sm:$0xff]  ;;  %v354_v33 = vmov 0  }
   0xa   :  { %320 = vset.pattern.permute.xlu1 %v354_v33  ;;  %321 = vset.pattern.permute.xlu0 %v354_v33  ;;  %v290_v34 = vld [vmem:[%s439_s4] ss:$0 sm:$0xff]  ;;  %vm227_vm8 = vcmask 64512   ;;  %v254_v53 = vand.u32 127, %v50_v10  ;;  %s355_s4 = smov [#allocation3]   ;;  %vm263_vm11 = vcmask 1041409  }
   0xb   :  { %v49_v11 = vunpack.c.0.s8 %v48_v9  ;;  %v131_v17 = vsub.s32 0, %v51_v12  ;;  %240 = vperm.xlu1 %320, %v292_v32   ;;  %v291_v42 = vld [vmem:[%s440_s5] ss:$0 sm:$0xff]  ;;  %s274_s5 = sshll.u32 %s355_s4, 4  ;;  %vm266_vm12 = vcmask 58368   ;;  %s275_s5 = int_to_ptr.vmem [resolvable:$true] %s274_s5 }
   0xc   :  { %304 = vmatmul.mubr.msk.bf16.vlgmr.msra.gmra.mrb[0].mxu0 %vm80_vm2, %v324_v5  ;;  %310 = vmatpush3.bf16.msra.mxu1 %v326_v7  ;;  %v257_v57 = vsub.s32 %v254_v53, %v51_v12  ;;  %s327_s14 = scalar_lea.vmem %s275_s5, 32  ;;  %p332_p1 = scmp.lt.s32.totalorder %s275_s5, %s275_s5 }
   0xd   :  { %v52_v14 = vsub.s32 %v49_v11, %v51_v12  ;;  %p328_p0 = scmp.ne.s32.totalorder %s275_s5, %s327_s14  ;;  %p333_p2 = scmp.lt.s32.totalorder %s327_s14, %s327_s14 }
   0xf   :  { %v53_v16 = vrot.slane %v282_v13, %v52_v14  ;;  %v60_v18 = vrot.slane %v46_v15, %v52_v14  ;;  %p334_p3 = por %p333_p2, %p332_p1 }
  0x11   :  { %v132_v19 = vrot.slane %v53_v16, %v131_v17  ;;  %v136_v20 = vrot.slane %v60_v18, %v131_v17  ;;  %p335_p4 = pnand %p334_p3, %p328_p0 }
  0x8a   :  { %v241_v50 = vpop.permute.xlu1 %240 }
  0xdf   :  { %v122_v21 = vpop.f32.mrb[0].mxu0 }
  0xe0   :  { %v139_v22 = vadd.f32 %v132_v19, %v122_v21  ;;  %v305_v23 = vpop.f32.mrb[1].mxu0 }
  0xe1   :  { %v125_v24 = vpop.f32.mrb[2].mxu0 }
  0xe2   :  { %v143_v25 = vmul.f32 0.01, %v139_v22  ;;  %v140_v26 = vadd.f32 %v136_v20, %v125_v24  ;;  %v306_v27 = vpop.f32.mrb[3].mxu0  ;;  %vm141_vm3 = vcmp.gt.f32.partialorder %v139_v22, 0.0 }
  0xe4   :  { %vm142_vm4 = vcmp.gt.f32.partialorder %v140_v26, 0.0  ;;  %v144_v28 = vmul.f32 0.01, %v140_v26  ;;  %v145_v29 = vsel %vm141_vm3, %v139_v22, %v143_v25 }
  0xe6   :  { %v146_v30 = vsel %vm142_vm4, %v140_v26, %v144_v28 }
  0xe7   :  { %v147_v31 = vpack.c.bf16 %v146_v30, %v145_v29 }
  0xe9   :  { %312 = vmatmul.mubr.msk.bf16.vlgmr.msra.gmra.mrb[0].mxu1 %vm160_vm5, %v147_v31 }
 0x1bc   :  { %v198_v35 = vpop.f32.mrb[0].mxu1 }
 0x1bd   :  { %v211_v36 = vadd.f32 %v290_v34, %v198_v35  ;;  %v313_v37 = vpop.f32.mrb[1].mxu1 }
 0x1be   :  { %v201_v38 = vpop.f32.mrb[2].mxu1 }
 0x1bf   :  { %v215_v39 = vmul.f32 0.01, %v211_v36  ;;  %v212_v40 = vadd.f32 %v290_v34, %v201_v38  ;;  %v314_v41 = vpop.f32.mrb[3].mxu1  ;;  %vm213_vm6 = vcmp.gt.f32.partialorder %v211_v36, 0.0 }
 0x1c1   :  { %vm214_vm7 = vcmp.gt.f32.partialorder %v212_v40, 0.0  ;;  %v216_v43 = vmul.f32 0.01, %v212_v40  ;;  %v217_v44 = vsel %vm213_vm6, %v211_v36, %v215_v39 }
 0x1c2   :  { %v225_v45 = vmul.f32 %v291_v42, %v217_v44 }
 0x1c3   :  { %v218_v46 = vsel %vm214_vm7, %v212_v40, %v216_v43 }
 0x1c4   :  { %v228_v47 = vsel %vm227_vm8, %v225_v45, 0.0  ;;  %v226_v48 = vmul.f32 %v291_v42, %v218_v46 }
 0x1c5   :  { %229 = vadd.xlane.f32.xlu0 %v228_v47 }
 0x1c6   :  { %v231_v49 = vsel %vm227_vm8, %v226_v48, 0.0 }
 0x1c9   :  { %232 = vadd.xlane.f32.xlu0 %v231_v49 }
 0x252   :  { %v230_v51 = vpop.xlane.xlu0 %229 }
 0x253   :  { %v243_v52 = vadd.f32 %v241_v50, %v230_v51 }
 0x255   :  { %v247_v54 = vmul.f32 0.01, %v243_v52  ;;  %vm245_vm9 = vcmp.gt.f32.partialorder %v243_v52, 0.0 }
 0x256   :  { %v233_v55 = vpop.xlane.xlu0 %232 }
 0x257   :  { %v244_v56 = vadd.f32 %v241_v50, %v233_v55  ;;  %v249_v58 = vsel %vm245_vm9, %v243_v52, %v247_v54 }
 0x258   :  { %v258_v61 = vrot.slane %v249_v58, %v257_v57 }
 0x259   :  { %vm246_vm10 = vcmp.gt.f32.partialorder %v244_v56, 0.0  ;;  %v248_v59 = vmul.f32 0.01, %v244_v56 }
 0x25b   :  { %v250_v60 = vsel %vm246_vm10, %v244_v56, %v248_v59 }
 0x25c   :  { %v262_v62 = vrot.slane %v250_v60, %v257_v57 }
 0x25e   :  { %v264_v63 = vsel %vm263_vm11, %v262_v62, %v258_v61 }
 0x25f   :  { %267 = vst.msk [vmem:[#allocation3] sm:$0x3] %vm266_vm12, %v264_v63 }
 0x260   :  { %338 = shalt.err (!%p335_p4)
}
 0x261   :  { %s339_s17 = scalar_lea.hbm %s442_s7, 32 }
 0x262   :  { %p340_p5 = scmp.ne.s32.totalorder %s442_s7, %s339_s17  ;;  %p343_p6 = scmp.lt.u32.totalorder %s339_s17, %s442_s7 }
 0x264   :  { %p345_p7 = pnand %p343_p6, %p340_p5 }
 0x266   :  { %348 = shalt.err (!%p345_p7)
}
 0x267   :  { %277 = dma.vmem_to_hbm [thread:$0]  %s275_s5, 32, %s442_s7, [#allocation4]  }
 0x268   :  { %349 = dma.done.wait [#allocation4], 32  }
 0x269   :  { %350 = vsyncadd [#allocation4], 4294967264 }
 0x26a   :  { %281 = vsyncpa [#allocation4], 1 }

</bundles_post_ra>
